<compile_context>
chip_gen: v7x
topology: tpu7x:2x2x1
jax: 0.10.0
libtpu: 0.0.40
codegen_flags: <defaults>
</compile_context>

<pallas_src>
import math

import jax
import jax.numpy as jnp
from jax.experimental import pallas as pl
from jax.experimental.pallas import tpu as pltpu

INPUT_SIZE = 5
HIDDEN_SIZE = 10
OUTPUT_SIZE = 5


def _round_up(n, m):
    return ((n + m - 1) // m) * m


def _mlp_kernel(x_ref, w1_ref, b1_ref, w2_ref, b2_ref, o_ref):
    # Feature-major / batch-on-lanes layout:
    #   x_ref : [IN,  TB]    w1_ref: [HID, IN]   b1_ref: [HID, 1]
    #   w2_ref: [OUT, HID]   b2_ref: [OUT, 1]    o_ref : [OUT, TB]
    x = x_ref[...]
    # fc1 (f32 MXU accumulate) + bias (broadcast over batch lanes) + ReLU
    h = jnp.dot(w1_ref[...], x, preferred_element_type=jnp.float32)
    h = jnp.maximum(h + b1_ref[...], 0.0)
    # fc2 — keep the inter-layer activation in f32 (no downcast between layers)
    out = jnp.dot(w2_ref[...], h, preferred_element_type=jnp.float32)
    o_ref[...] = (out + b2_ref[...]).astype(o_ref.dtype)


def simple_nn_forward(x, w1, b1, w2, b2, *, batch_tile=1024):
    """SimpleNN forward pass.

    x : [B, INPUT_SIZE]
    Weights in torch nn.Linear layout:
      w1: [HIDDEN_SIZE, INPUT_SIZE],  b1: [HIDDEN_SIZE]
      w2: [OUTPUT_SIZE, HIDDEN_SIZE], b2: [OUTPUT_SIZE]
    Returns [B, OUTPUT_SIZE].
    """
    B = x.shape[0]

    # Batch goes on the lane axis; the lane tile must be a multiple of 128.
    # Per-tile VMEM (double-buffered in+out at tb=1024, f32) is ~80 KiB — far
    # under the 32 MiB scoped / 64 MiB physical VMEM of v7x, so no explicit
    # vmem_limit_bytes is needed.
    tb = min(_round_up(batch_tile, 128), _round_up(B, 128))
    B_pad = _round_up(B, tb)
    num_tiles = B_pad // tb

    x_t = jnp.pad(x, ((0, B_pad - B), (0, 0))).T            # [IN, B_pad]
    b1_2d = b1.reshape(-1, 1).astype(jnp.float32)            # [HID, 1]
    b2_2d = b2.reshape(-1, 1).astype(jnp.float32)            # [OUT, 1]

    # Constant index_map -> weights/biases DMA'd once, resident across steps.
    const = lambda shape: pl.BlockSpec(shape, lambda i: (0, 0))

    itemsize = jnp.dtype(x.dtype).itemsize
    flops = 2 * B_pad * (INPUT_SIZE * HIDDEN_SIZE + HIDDEN_SIZE * OUTPUT_SIZE)
    bytes_accessed = (
        x_t.size * itemsize
        + w1.size * jnp.dtype(w1.dtype).itemsize
        + w2.size * jnp.dtype(w2.dtype).itemsize
        + b1_2d.size * 4 + b2_2d.size * 4
        + OUTPUT_SIZE * B_pad * itemsize
    )

    out_t = pl.pallas_call(
        _mlp_kernel,
        out_shape=jax.ShapeDtypeStruct((OUTPUT_SIZE, B_pad), x.dtype),
        grid=(num_tiles,),
        in_specs=[
            pl.BlockSpec((INPUT_SIZE, tb), lambda i: (0, i)),   # x_T batch tile
            const((HIDDEN_SIZE, INPUT_SIZE)),                   # w1
            const((HIDDEN_SIZE, 1)),                            # b1
            const((OUTPUT_SIZE, HIDDEN_SIZE)),                  # w2
            const((OUTPUT_SIZE, 1)),                            # b2
        ],
        out_specs=pl.BlockSpec((OUTPUT_SIZE, tb), lambda i: (0, i)),
        compiler_params=pltpu.CompilerParams(
            dimension_semantics=("parallel",)),                 # megacore on v7x
        cost_estimate=pl.CostEstimate(
            flops=flops, transcendentals=0, bytes_accessed=bytes_accessed),
    )(x_t, w1, b1_2d, w2, b2_2d)

    # Drop batch padding, back to [B, OUTPUT_SIZE].
    return out_t[:, :B].T


def init_params(key):
    """Deterministic init mimicking torch.nn.Linear default (uniform +/- 1/sqrt(fan_in)),
    stored in torch layout: weight = [out_features, in_features]."""
    k1, k2, k3, k4 = jax.random.split(key, 4)
    bound1 = 1.0 / math.sqrt(INPUT_SIZE)
    bound2 = 1.0 / math.sqrt(HIDDEN_SIZE)
    w1 = jax.random.uniform(k1, (HIDDEN_SIZE, INPUT_SIZE), jnp.float32,
                            minval=-bound1, maxval=bound1)
    b1 = jax.random.uniform(k2, (HIDDEN_SIZE,), jnp.float32,
                            minval=-bound1, maxval=bound1)
    w2 = jax.random.uniform(k3, (OUTPUT_SIZE, HIDDEN_SIZE), jnp.float32,
                            minval=-bound2, maxval=bound2)
    b2 = jax.random.uniform(k4, (OUTPUT_SIZE,), jnp.float32,
                            minval=-bound2, maxval=bound2)
    return w1, b1, w2, b2


if __name__ == "__main__":
    key = jax.random.PRNGKey(0)
    k_x, k_x2, k_p = jax.random.split(key, 3)
    w1, b1, w2, b2 = init_params(k_p)

    def ref_fn(xx):
        return jnp.maximum(xx @ w1.T + b1, 0.0) @ w2.T + b2

    # Small batch (single grid step; batch padded 8 -> 128 lanes).
    x = jax.random.normal(k_x, (8, INPUT_SIZE), jnp.float32)
    out = jax.block_until_ready(simple_nn_forward(x, w1, b1, w2, b2))
    assert out.shape == (8, OUTPUT_SIZE)
    assert jnp.allclose(out, ref_fn(x), atol=1e-5, rtol=1e-5)

    # Non-multiple-of-128 batch exercising the multi-tile (grid > 1) path.
    x2 = jax.random.normal(k_x2, (300, INPUT_SIZE), jnp.float32)
    out2 = jax.block_until_ready(
        simple_nn_forward(x2, w1, b1, w2, b2, batch_tile=128))
    assert out2.shape == (300, OUTPUT_SIZE)
    assert jnp.allclose(out2, ref_fn(x2), atol=1e-5, rtol=1e-5)

    print("KERNEL_OK")
</pallas_src>

<mosaic_0001>
module attributes {stable_mosaic.version = 11 : i64} {
  func.func @_mlp_kernel(%arg0: i32, %arg1: memref<5x128xf32, #tpu.memory_space<vmem>>, %arg2: memref<10x5xf32, #tpu.memory_space<vmem>>, %arg3: memref<10x1xf32, #tpu.memory_space<vmem>>, %arg4: memref<5x10xf32, #tpu.memory_space<vmem>>, %arg5: memref<5x1xf32, #tpu.memory_space<vmem>>, %arg6: memref<5x128xf32, #tpu.memory_space<vmem>>) attributes {dimension_semantics = [#tpu.dimension_semantics<parallel>], iteration_bounds = array<i64: 1>, scalar_prefetch = 0 : i64, scratch_operands = 0 : i64, tpu.core_type = #tpu.core_type<tc>, window_params = [{transform_indices = @transform_0, window_bounds = array<i64: 5, 128>}, {pipeline_mode = #tpu.pipeline_mode<synchronous>, transform_indices = @transform_1, window_bounds = array<i64: 10, 5>}, {pipeline_mode = #tpu.pipeline_mode<synchronous>, transform_indices = @transform_2, window_bounds = array<i64: 10, 1>}, {pipeline_mode = #tpu.pipeline_mode<synchronous>, transform_indices = @transform_3, window_bounds = array<i64: 5, 10>}, {pipeline_mode = #tpu.pipeline_mode<synchronous>, transform_indices = @transform_4, window_bounds = array<i64: 5, 1>}, {transform_indices = @transform_5, window_bounds = array<i64: 5, 128>}]} {
    %c0 = arith.constant 0 : index
    %c0_0 = arith.constant 0 : index
    %0 = vector.load %arg1[%c0, %c0_0] : memref<5x128xf32, #tpu.memory_space<vmem>>, vector<5x128xf32>
    %c0_1 = arith.constant 0 : index
    %c0_2 = arith.constant 0 : index
    %1 = vector.load %arg2[%c0_1, %c0_2] : memref<10x5xf32, #tpu.memory_space<vmem>>, vector<10x5xf32>
    %cst = arith.constant dense<0.000000e+00> : vector<10x128xf32>
    %2 = tpu.matmul %1, %0, %cst {dimension_numbers = #tpu.dot_dimension_numbers<[1], [0], [0], [1], [0, 0, 1, 1], [], []>} : vector<10x5xf32>, vector<5x128xf32>, vector<10x128xf32> -> vector<10x128xf32>
    %c0_3 = arith.constant 0 : index
    %c0_4 = arith.constant 0 : index
    %3 = vector.load %arg3[%c0_3, %c0_4] : memref<10x1xf32, #tpu.memory_space<vmem>>, vector<10x1xf32>
    %4 = vector.broadcast %3 : vector<10x1xf32> to vector<10x128xf32>
    %5 = arith.addf %2, %4 : vector<10x128xf32>
    %cst_5 = arith.constant 0.000000e+00 : f32
    %6 = vector.broadcast %cst_5 : f32 to vector<10x128xf32>
    %7 = arith.maximumf %5, %6 : vector<10x128xf32>
    %c0_6 = arith.constant 0 : index
    %c0_7 = arith.constant 0 : index
    %8 = vector.load %arg4[%c0_6, %c0_7] : memref<5x10xf32, #tpu.memory_space<vmem>>, vector<5x10xf32>
    %cst_8 = arith.constant dense<0.000000e+00> : vector<5x128xf32>
    %9 = tpu.matmul %8, %7, %cst_8 {dimension_numbers = #tpu.dot_dimension_numbers<[1], [0], [0], [1], [0, 0, 1, 1], [], []>} : vector<5x10xf32>, vector<10x128xf32>, vector<5x128xf32> -> vector<5x128xf32>
    %c0_9 = arith.constant 0 : index
    %c0_10 = arith.constant 0 : index
    %10 = vector.load %arg5[%c0_9, %c0_10] : memref<5x1xf32, #tpu.memory_space<vmem>>, vector<5x1xf32>
    %11 = vector.broadcast %10 : vector<5x1xf32> to vector<5x128xf32>
    %12 = arith.addf %9, %11 : vector<5x128xf32>
    %c0_11 = arith.constant 0 : index
    %c0_12 = arith.constant 0 : index
    %13 = vector.load %arg6[%c0_11, %c0_12] : memref<5x128xf32, #tpu.memory_space<vmem>>, vector<5x128xf32>
    tpu.vector_store %arg6[%c0_11, %c0_12], %12 {strides = array<i32>} : memref<5x128xf32, #tpu.memory_space<vmem>>, vector<5x128xf32>,
    return
  }
  func.func @transform_0(%arg0: i32) -> (i32, i32) {
    %c0_i32 = arith.constant 0 : i32
    %c0_i32_0 = arith.constant 0 : i32
    return %c0_i32, %arg0 : i32, i32
  }
  func.func @transform_1(%arg0: i32) -> (i32, i32) {
    %c0_i32 = arith.constant 0 : i32
    %c0_i32_0 = arith.constant 0 : i32
    %c0_i32_1 = arith.constant 0 : i32
    return %c0_i32, %c0_i32_0 : i32, i32
  }
  func.func @transform_2(%arg0: i32) -> (i32, i32) {
    %c0_i32 = arith.constant 0 : i32
    %c0_i32_0 = arith.constant 0 : i32
    %c0_i32_1 = arith.constant 0 : i32
    return %c0_i32, %c0_i32_0 : i32, i32
  }
  func.func @transform_3(%arg0: i32) -> (i32, i32) {
    %c0_i32 = arith.constant 0 : i32
    %c0_i32_0 = arith.constant 0 : i32
    %c0_i32_1 = arith.constant 0 : i32
    return %c0_i32, %c0_i32_0 : i32, i32
  }
  func.func @transform_4(%arg0: i32) -> (i32, i32) {
    %c0_i32 = arith.constant 0 : i32
    %c0_i32_0 = arith.constant 0 : i32
    %c0_i32_1 = arith.constant 0 : i32
    return %c0_i32, %c0_i32_0 : i32, i32
  }
  func.func @transform_5(%arg0: i32) -> (i32, i32) {
    %c0_i32 = arith.constant 0 : i32
    %c0_i32_0 = arith.constant 0 : i32
    return %c0_i32, %arg0 : i32, i32
  }
}

</mosaic_0001>

<bundles_post_ra>
// kernel: tpu_custom_call.1
= control target key start
LH: loop header
LB: loop body
LE: loop exit
PB: predicated region body
PF: predicated region fallthrough
CT: control target
= control target key end

     0   :  { %vm43_vm0 = vcmask 1044480   ;;  %vm36_vm1 = vcmask 39936   ;;  %v283_v4 = vmov 0   ;;  %s352_s0 = inlined_call_operand.vmem [shape: f32[5,128], index: 0, kind: input, shape index: {}]   ;;  %s353_s1 = inlined_call_operand.vmem [shape: f32[10,5], index: 1, kind: input, shape index: {}]   ;;  %s354_s2 = inlined_call_operand.vmem [shape: f32[10,1], index: 2, kind: input, shape index: {}]   ;;  %s355_s3 = inlined_call_operand.vmem [shape: f32[5,10], index: 3, kind: input, shape index: {}]   ;;  %s356_s4 = inlined_call_operand.vmem [shape: f32[5,1], index: 4, kind: input, shape index: {}]   ;;  %s357_s5 = inlined_call_operand.hbm [shape: f32[5,128], index: 5, kind: output, shape index: {}]  }
   0x1   :  { %v21_v0 = vld [vmem:[%s352_s0] sm:$0x1f]  ;;  %v23_v2 = vld [vmem:[%s353_s1 + $0x8] sm:$0x3]  ;;  %257 = vset.pattern.permute.xlu0 %v283_v4 }
   0x2   :  { %v22_v1 = vld [vmem:[%s353_s1] sm:$0xff]  ;;  %235 = vmatprep.subr.msk.mxu0 %vm43_vm0, %v21_v0 }
   0x3   :  { %237 = vmatprep.mubr.msk.f32.mxu0 %vm36_vm1, %v22_v1  ;;  %v24_v3 = vld [vmem:[%s354_s2] sm:$0xff]  ;;  %236 = vmatpush3.msk.msra.mxu0 %vm43_vm0, %v21_v0 }
   0x4   :  { %10 = vsyncpa [#allocation3], 0  ;;  %238 = vmatmul.mubr.msk.f32.vlgmr.msra.gmra.mrb[0].mxu0 %vm36_vm1, %v23_v2  ;;  %28 = vperm.xlu0 %257, %v24_v3   ;;  %v25_v5 = vld [vmem:[%s354_s2 + $0x8] sm:$0x3]  ;;  %v284_v6 = vmov 0.0|0.0   ;;  %vm285_vm2 = vmmov 0  }
   0x5   :  { %258 = vset.pattern.permute.xlu1 %v283_v4  ;;  %247 = vmatprep.subr.bf16.mxu1 %v284_v6  ;;  %v286_v7 = vmov 0.0   ;;  %v125_v8 = vld [vmem:[%s356_s4] sm:$0x1f]  ;;  %vm135_vm3 = vcmask 1041408   ;;  %vm287_vm4 = vmmov 1   ;;  %vm131_vm6 = vcmask 80896  }
   0x6   :  { %244 = vmatprep.mubr.msk.f32.mxu1 %vm285_vm2, %v286_v7  ;;  %128 = vperm.xlu1 %258, %v125_v8   ;;  %vm249_vm5 = vmpackc.low %vm135_vm3, %vm287_vm4  ;;  %v124_v18 = vld [vmem:[%s355_s3] sm:$0x1f]  ;;  %s288_s4 = smov [#allocation2]  }
   0x7   :  { %s216_s29 = sshll.u32 %s288_s4, 4  ;;  %s217_s29 = int_to_ptr.vmem [resolvable:$true] %s216_s29 }
   0x8   :  { %33 = vperm.xlu0 %257, %v25_v5   ;;  %s259_s30 = scalar_lea.vmem %s217_s29, 128  ;;  %p264_p1 = scmp.lt.s32.totalorder %s217_s29, %s217_s29 }
   0x9   :  { %p260_p0 = scmp.ne.s32.totalorder %s217_s29, %s259_s30  ;;  %p265_p2 = scmp.lt.s32.totalorder %s259_s30, %s259_s30 }
   0xb   :  { %p266_p3 = por %p265_p2, %p264_p1 }
   0xd   :  { %p267_p4 = pnand %p266_p3, %p260_p0 }
  0x83   :  { %v29_v9 = vpop.permute.xlu0 %28 }
  0x85   :  { %v129_v19 = vpop.permute.xlu1 %128 }
  0x87   :  { %v34_v10 = vpop.permute.xlu0 %33 }
  0xd7   :  { %v239_v11 = vpop.f32.mrb[0].mxu0 }
  0xd8   :  { %v119_v12 = vadd.f32 %v239_v11, %v34_v10  ;;  %v113_v13 = vpop.f32.mrb[1].mxu0 }
  0xd9   :  { %v114_v14 = vadd.f32 %v113_v13, %v29_v9 }
  0xda   :  { %v123_v15 = vmax.f32 %v119_v12, 0.0 }
  0xdb   :  { %v122_v16 = vmax.f32 %v114_v14, 0.0 }
  0xdd   :  { %v248_v17 = vpack.c.bf16 %v123_v15, %v122_v16 }
  0xdf   :  { %250 = vmatpush3.bf16.msk.msra.mxu1 %vm249_vm5, %v248_v17 }
  0xe2   :  { %245 = vmatmul.mubr.msk.f32.vlgmr.msra.gmra.mrb[0].mxu1 %vm131_vm6, %v124_v18 }
 0x1b5   :  { %v205_v20 = vpop.f32.mrb[0].mxu1 }
 0x1b6   :  { %v206_v21 = vadd.f32 %v205_v20, %v129_v19  ;;  %v246_v22 = vpop.f32.mrb[1].mxu1 }
 0x1b8   :  { %209 = vst [vmem:[#allocation2] sm:$0x1f] %v206_v21 }
 0x1b9   :  { %270 = shalt.err (!%p267_p4)
}
 0x1ba   :  { %s271_s3 = scalar_lea.hbm %s357_s5, 128 }
 0x1bb   :  { %p272_p5 = scmp.ne.s32.totalorder %s357_s5, %s271_s3  ;;  %p275_p6 = scmp.lt.u32.totalorder %s271_s3, %s357_s5 }
 0x1bd   :  { %p277_p7 = pnand %p275_p6, %p272_p5 }
 0x1bf   :  { %280 = shalt.err (!%p277_p7)
}
 0x1c0   :  { %219 = dma.vmem_to_hbm [thread:$0]  %s217_s29, 128, %s357_s5, [#allocation3]  }
 0x1c1   :  { %281 = dma.done.wait [#allocation3], 128  }
 0x1c2   :  { %282 = vsyncadd [#allocation3], 4294967168 }
 0x1c3   :  { %223 = vsyncpa [#allocation3], 1 }

</bundles_post_ra>
